<compile_context>
chip_gen: v7x
topology: tpu7x:2x2x1
jax: 0.10.0
libtpu: 0.0.40
codegen_flags: <defaults>
</compile_context>

<pallas_src>
import jax
import jax.numpy as jnp
from jax.experimental import pallas as pl
from jax.experimental.pallas import tpu as pltpu


# ------------------------------- Pallas kernel -------------------------------

def _flip_stereo_kernel(x_ref, o_ref):
    # x_ref / o_ref: (TM, 2*T) VMEM tile.  Columns [0:T] = channel 0, [T:2T] = channel 1.
    # Swap the halves: out ch0 <- in ch1, out ch1 <- in ch0 (matches torch.gather with
    # indices all-ones / all-zeros along dim 2).
    t = x_ref.shape[-1] // 2
    o_ref[:, :t] = x_ref[:, t:]
    o_ref[:, t:] = x_ref[:, :t]


def _row_tile(n_rows: int, row_bytes: int) -> int:
    """Pick a row-tile size: big enough to amortize per-step overhead, small enough that
    2 inputs+outputs x double buffering stays well under the scoped VMEM limit on all
    of v5e / v6e / v7x."""
    budget = 2 * 1024 * 1024                       # ~2 MiB per tile buffer
    tm = max(1, budget // max(1, row_bytes))
    tm = min(tm, n_rows)
    if n_rows >= 8:
        tm = max(8, (tm // 8) * 8)                 # keep sublane dim a multiple of 8
    else:
        tm = n_rows                                # full-extent block (allowed for any size)
    return tm


def pallas_flip_stereo(y: jax.Array) -> jax.Array:
    B, S, C, T = y.shape
    assert C == 2, "FlipStereo kernel only applies to stereo (C == 2) input"
    n_rows = B * S
    x = y.reshape(n_rows, C * T)                   # contiguous reshape: row = [left_T | right_T]

    tm = _row_tile(n_rows, C * T * x.dtype.itemsize)
    grid = (pl.cdiv(n_rows, tm),)

    out = pl.pallas_call(
        _flip_stereo_kernel,
        grid=grid,
        out_shape=jax.ShapeDtypeStruct((n_rows, C * T), x.dtype),
        in_specs=[pl.BlockSpec((tm, C * T), lambda i: (i, 0))],
        out_specs=pl.BlockSpec((tm, C * T), lambda i: (i, 0)),
        compiler_params=pltpu.CompilerParams(
            dimension_semantics=("parallel",),     # shard row tiles across TCs (v7x megacore)
        ),
    )(x)
    return out.reshape(B, S, C, T)


# ---------------------------------- module -----------------------------------

class FlipStereo:
    """Pallas/JAX port of the PyTorch FlipStereo augmentation."""

    def __init__(self, p: float = 0.5):
        self.p = p
        self.training = True

    def __call__(self, y: jax.Array, apply_draw: float) -> jax.Array:
        # TODO(synk): Python random.random() is replaced by the deterministic apply_draw
        # argument; the Bernoulli gate stays a host-side branch (it changes no shapes).
        B, S, C, T = y.shape
        if self.training and C == 2 and float(apply_draw) < self.p:
            return pallas_flip_stereo(y)
        return y


if __name__ == "__main__":
    # Small demo shapes consistent with the module's (B, S, C, T) audio layout.
    B, S, C, T = 2, 2, 2, 1024

    key = jax.random.PRNGKey(0)
    y = jax.random.normal(key, (B, S, C, T), dtype=jnp.float32)

    mod = FlipStereo(p=0.5)
    mod.training = True

    # apply_draw < p -> channels are flipped via the Pallas kernel
    out = jax.block_until_ready(mod(y, apply_draw=0.25))
    assert out.shape == y.shape and out.dtype == y.dtype
    assert bool(jnp.all(out[:, :, 0, :] == y[:, :, 1, :]))
    assert bool(jnp.all(out[:, :, 1, :] == y[:, :, 0, :]))

    # apply_draw >= p -> identity pass-through
    out_id = jax.block_until_ready(mod(y, apply_draw=0.9))
    assert bool(jnp.all(out_id == y))

    # non-stereo input -> identity pass-through (module only flips when C == 2)
    y3 = jax.random.normal(key, (B, S, 3, T), dtype=jnp.float32)
    out3 = jax.block_until_ready(mod(y3, apply_draw=0.0))
    assert bool(jnp.all(out3 == y3))

    print("KERNEL_OK")
</pallas_src>

<mosaic_0001>
module attributes {stable_mosaic.version = 11 : i64} {
  func.func @_flip_stereo_kernel(%arg0: i32, %arg1: memref<4x2048xf32, #tpu.memory_space<vmem>>, %arg2: memref<4x2048xf32, #tpu.memory_space<vmem>>) attributes {dimension_semantics = [#tpu.dimension_semantics<parallel>], iteration_bounds = array<i64: 1>, scalar_prefetch = 0 : i64, scratch_operands = 0 : i64, tpu.core_type = #tpu.core_type<tc>, window_params = [{transform_indices = @transform_0, window_bounds = array<i64: 4, 2048>}, {transform_indices = @transform_1, window_bounds = array<i64: 4, 2048>}]} {
    %c0 = arith.constant 0 : index
    %c1024 = arith.constant 1024 : index
    %0 = vector.load %arg1[%c0, %c1024] : memref<4x2048xf32, #tpu.memory_space<vmem>>, vector<4x1024xf32>
    %c0_0 = arith.constant 0 : index
    %c0_1 = arith.constant 0 : index
    %1 = vector.load %arg2[%c0_0, %c0_1] : memref<4x2048xf32, #tpu.memory_space<vmem>>, vector<4x1024xf32>
    tpu.vector_store %arg2[%c0_0, %c0_1], %0 {strides = array<i32>} : memref<4x2048xf32, #tpu.memory_space<vmem>>, vector<4x1024xf32>,
    %c0_2 = arith.constant 0 : index
    %c0_3 = arith.constant 0 : index
    %2 = vector.load %arg1[%c0_2, %c0_3] : memref<4x2048xf32, #tpu.memory_space<vmem>>, vector<4x1024xf32>
    %c0_4 = arith.constant 0 : index
    %c1024_5 = arith.constant 1024 : index
    %3 = vector.load %arg2[%c0_4, %c1024_5] : memref<4x2048xf32, #tpu.memory_space<vmem>>, vector<4x1024xf32>
    tpu.vector_store %arg2[%c0_4, %c1024_5], %2 {strides = array<i32>} : memref<4x2048xf32, #tpu.memory_space<vmem>>, vector<4x1024xf32>,
    return
  }
  func.func @transform_0(%arg0: i32) -> (i32, i32) {
    %c0_i32 = arith.constant 0 : i32
    %c0_i32_0 = arith.constant 0 : i32
    return %arg0, %c0_i32 : i32, i32
  }
  func.func @transform_1(%arg0: i32) -> (i32, i32) {
    %c0_i32 = arith.constant 0 : i32
    %c0_i32_0 = arith.constant 0 : i32
    return %arg0, %c0_i32 : i32, i32
  }
}

</mosaic_0001>

<bundles_post_ra>
// kernel: tpu_custom_call.1
= control target key start
LH: loop header
LB: loop body
LE: loop exit
PB: predicated region body
PF: predicated region fallthrough
CT: control target
= control target key end

     0   :  { %6 = vsyncpa [#allocation3], 0  ;;  %s138_s0 = inlined_call_operand.hbm [shape: f32[4,2048], index: 0, kind: input, shape index: {}]   ;;  %s139_s1 = inlined_call_operand.hbm [shape: f32[4,2048], index: 1, kind: output, shape index: {}]  }
   0x1   :  { %7 = vsyncpa [#allocation4], 0  ;;  %s102_s6 = smov [#allocation2]   ;;  %s54_s10 = scalar_lea.hbm %s138_s0, 1024 }
   0x2   :  { %s14_s7 = sshll.u32 %s102_s6, 4  ;;  %p55_p0 = scmp.ne.s32.totalorder %s138_s0, %s54_s10  ;;  %s15_s7 = int_to_ptr.vmem [resolvable:$true] %s14_s7 }
   0x3   :  { %p58_p1 = scmp.lt.u32.totalorder %s54_s10, %s138_s0 }
   0x5   :  { %p60_p2 = pnand %p58_p1, %p55_p0 }
   0x7   :  { %63 = shalt.err (!%p60_p2)
}
   0x8   :  { %s64_s15 = scalar_lea.vmem %s15_s7, 1024  ;;  %p69_p4 = scmp.lt.s32.totalorder %s15_s7, %s15_s7 }
   0x9   :  { %p65_p3 = scmp.ne.s32.totalorder %s15_s7, %s64_s15  ;;  %p70_p5 = scmp.lt.s32.totalorder %s64_s15, %s64_s15 }
   0xb   :  { %p71_p6 = por %p70_p5, %p69_p4 }
   0xd   :  { %p72_p7 = pnand %p71_p6, %p65_p3 }
   0xf   :  { %75 = shalt.err (!%p72_p7)
}
  0x10   :  { %17 = dma.hbm_to_vmem [thread:$0]  %s138_s0, 1024, %s15_s7, [#allocation3]  }
  0x11   :  { %98 = dma.done.wait [#allocation3], 1024  }
  0x12   :  { %99 = vsyncadd [#allocation3], 4294966272  ;;  %s103_s18 = smov [#allocation5]   ;;  %v21_v0 = vld [vmem:[#allocation2 + $0x20] sm:$0xff]  ;;  %v22_v1 = vld [vmem:[#allocation2 + $0x28] sm:$0xff] }
  0x13   :  { %s43_s19 = sshll.u32 %s103_s18, 4  ;;  %v23_v2 = vld [vmem:[#allocation2 + $0x30] sm:$0xff]  ;;  %25 = vst [vmem:[#allocation5] sm:$0xff] %v21_v0  ;;  %26 = vst [vmem:[#allocation5 + $0x8] sm:$0xff] %v22_v1  ;;  %v24_v3 = vld [vmem:[#allocation2 + $0x38] sm:$0xff]  ;;  %s44_s19 = int_to_ptr.vmem [resolvable:$true] %s43_s19 }
  0x14   :  { %27 = vst [vmem:[#allocation5 + $0x10] sm:$0xff] %v23_v2  ;;  %v29_v4 = vld [vmem:[#allocation2] sm:$0xff]  ;;  %v30_v5 = vld [vmem:[#allocation2 + $0x8] sm:$0xff]  ;;  %28 = vst [vmem:[#allocation5 + $0x18] sm:$0xff] %v24_v3  ;;  %s76_s0 = scalar_lea.vmem %s44_s19, 1024  ;;  %p81_p9 = scmp.lt.s32.totalorder %s44_s19, %s44_s19 }
  0x15   :  { %33 = vst [vmem:[#allocation5 + $0x20] sm:$0xff] %v29_v4  ;;  %34 = vst [vmem:[#allocation5 + $0x28] sm:$0xff] %v30_v5  ;;  %v31_v6 = vld [vmem:[#allocation2 + $0x10] sm:$0xff]  ;;  %v32_v7 = vld [vmem:[#allocation2 + $0x18] sm:$0xff]  ;;  %p77_p8 = scmp.ne.s32.totalorder %s44_s19, %s76_s0  ;;  %p82_p10 = scmp.lt.s32.totalorder %s76_s0, %s76_s0 }
  0x16   :  { %35 = vst [vmem:[#allocation5 + $0x30] sm:$0xff] %v31_v6  ;;  %36 = vst [vmem:[#allocation5 + $0x38] sm:$0xff] %v32_v7 }
  0x17   :  { %p83_p11 = por %p82_p10, %p81_p9 }
  0x19   :  { %p84_p12 = pnand %p83_p11, %p77_p8 }
  0x1b   :  { %87 = shalt.err (!%p84_p12)
}
  0x1c   :  { %s88_s22 = scalar_lea.hbm %s139_s1, 1024 }
  0x1d   :  { %p89_p13 = scmp.ne.s32.totalorder %s139_s1, %s88_s22  ;;  %p92_p0 = scmp.lt.u32.totalorder %s88_s22, %s139_s1 }
  0x1f   :  { %p94_p1 = pnand %p92_p0, %p89_p13 }
  0x21   :  { %97 = shalt.err (!%p94_p1)
}
  0x22   :  { %46 = dma.vmem_to_hbm [thread:$0]  %s44_s19, 1024, %s139_s1, [#allocation4]  }
  0x23   :  { %100 = dma.done.wait [#allocation4], 1024  }
  0x24   :  { %101 = vsyncadd [#allocation4], 4294966272 }
  0x25   :  { %50 = vsyncpa [#allocation3], 1 }
  0x26   :  { %51 = vsyncpa [#allocation4], 1 }

</bundles_post_ra>
